<compile_context>
chip_gen: v6e
topology: v6e:2x2x1
jax: 0.10.0
libtpu: 0.0.40
codegen_flags: <defaults>
</compile_context>

<pallas_src>
import functools

import jax
import jax.numpy as jnp
from jax.experimental import pallas as pl
from jax.experimental.pallas import tpu as pltpu

_MASK_VALUE = -2.3819763e38  # large finite negative (NaN-safe causal mask)


def _tile(dim, target):
    """Use `target` if it divides `dim`, else fall back to the full dim."""
    return target if dim % target == 0 else dim


# ----------------------------------------------------------------------------
# Tiled matmul (nn.Linear, bias=False) — bf16 operands, f32 accumulation
# ----------------------------------------------------------------------------
def _matmul_kernel(x_ref, w_ref, o_ref, acc_ref):
    @pl.when(pl.program_id(2) == 0)
    def _():
        acc_ref[...] = jnp.zeros_like(acc_ref)

    acc_ref[...] += jnp.dot(x_ref[...].astype(jnp.bfloat16), w_ref[...],
                            preferred_element_type=jnp.float32)

    @pl.when(pl.program_id(2) == pl.num_programs(2) - 1)
    def _():
        o_ref[...] = acc_ref[...].astype(o_ref.dtype)


def linear(x, w, *, out_dtype=jnp.float32, tm=256, tn=256, tk=512):
    """y = x @ w. x: (M, K) f32/bf16, w: (K, N) bf16."""
    M, K = x.shape
    _, N = w.shape
    tm, tn, tk = _tile(M, tm), _tile(N, tn), _tile(K, tk)
    return pl.pallas_call(
        _matmul_kernel,
        out_shape=jax.ShapeDtypeStruct((M, N), out_dtype),
        grid=(M // tm, N // tn, K // tk),
        in_specs=[pl.BlockSpec((tm, tk), lambda i, j, k: (i, k)),
                  pl.BlockSpec((tk, tn), lambda i, j, k: (k, j))],
        out_specs=pl.BlockSpec((tm, tn), lambda i, j, k: (i, j)),
        scratch_shapes=[pltpu.VMEM((tm, tn), jnp.float32)],
        compiler_params=pltpu.CompilerParams(
            dimension_semantics=("parallel", "parallel", "arbitrary")),
    )(x, w)


# ----------------------------------------------------------------------------
# RMSNorm (standalone, used for the final norm) — tiled over rows
# ----------------------------------------------------------------------------
def _rmsnorm_kernel(x_ref, w_ref, o_ref, *, eps):
    x = x_ref[...].astype(jnp.float32)
    norm = jnp.sqrt(jnp.mean(x * x, axis=-1, keepdims=True)) + eps
    o_ref[...] = (x * (1.0 / norm)) * w_ref[...]


def rmsnorm(x, w, eps, *, tm=512):
    M, D = x.shape
    tm = _tile(M, tm)
    return pl.pallas_call(
        functools.partial(_rmsnorm_kernel, eps=eps),
        out_shape=jax.ShapeDtypeStruct((M, D), jnp.float32),
        grid=(M // tm,),
        in_specs=[pl.BlockSpec((tm, D), lambda i: (i, 0)),
                  pl.BlockSpec((1, D), lambda i: (0, 0))],
        out_specs=pl.BlockSpec((tm, D), lambda i: (i, 0)),
        compiler_params=pltpu.CompilerParams(dimension_semantics=("parallel",)),
    )(x, w.reshape(1, D))


# ----------------------------------------------------------------------------
# RoPE — Q and K rotated in one kernel, all heads per step, two half-writes
# ----------------------------------------------------------------------------
def _rope_kernel(q_ref, k_ref, cos_ref, sin_ref, qo_ref, ko_ref):
    half = q_ref.shape[-1] // 2
    cos = cos_ref[0][None]            # (1, ts, Dh) -> broadcast over heads
    sin = sin_ref[0][None]
    c1, c2 = cos[..., :half], cos[..., half:]
    s1, s2 = sin[..., :half], sin[..., half:]

    def rope(x_ref, o_ref):
        x = x_ref[0].astype(jnp.float32)          # (H, ts, Dh)
        x1, x2 = x[..., :half], x[..., half:]
        # out = x*cos + rotate_half(x)*sin, rotate_half(x) = [-x2, x1]
        o_ref[0, :, :, :half] = (x1 * c1 - x2 * s1).astype(o_ref.dtype)
        o_ref[0, :, :, half:] = (x2 * c2 + x1 * s2).astype(o_ref.dtype)

    rope(q_ref, qo_ref)
    rope(k_ref, ko_ref)


def apply_rope_qk(q, k, cos, sin, *, ts=512):
    """q: (B,Hq,S,Dh), k: (B,Hkv,S,Dh) (bf16); cos/sin: (B,S,Dh) f32."""
    B, Hq, S, D = q.shape
    Hkv = k.shape[1]
    ts = _tile(S, ts)
    return pl.pallas_call(
        _rope_kernel,
        out_shape=(jax.ShapeDtypeStruct((B, Hq, S, D), jnp.bfloat16),
                   jax.ShapeDtypeStruct((B, Hkv, S, D), jnp.bfloat16)),
        grid=(B, S // ts),
        in_specs=[pl.BlockSpec((1, Hq, ts, D), lambda b, s: (b, 0, s, 0)),
                  pl.BlockSpec((1, Hkv, ts, D), lambda b, s: (b, 0, s, 0)),
                  pl.BlockSpec((1, ts, D), lambda b, s: (b, s, 0)),
                  pl.BlockSpec((1, ts, D), lambda b, s: (b, s, 0))],
        out_specs=(pl.BlockSpec((1, Hq, ts, D), lambda b, s: (b, 0, s, 0)),
                   pl.BlockSpec((1, Hkv, ts, D), lambda b, s: (b, 0, s, 0))),
        compiler_params=pltpu.CompilerParams(
            dimension_semantics=("parallel", "parallel")),
    )(q, k, cos, sin)


# ----------------------------------------------------------------------------
# Attention — flash-style online softmax, GQA without repeat, fused output
# layout (B, S, d_model), no K transpose, approx reciprocal for the softmax.
# ----------------------------------------------------------------------------
def _attention_kernel(q_ref, k_ref, v_ref, o_ref, m_sc, l_sc, acc_sc,
                      *, scale, is_mask, n_rep):
    ki = pl.program_id(2)
    n_heads_q = q_ref.shape[1]
    tq, dh = q_ref.shape[2], q_ref.shape[3]
    tk = k_ref.shape[2]

    @pl.when(ki == 0)
    def _():
        m_sc[...] = jnp.full_like(m_sc, -jnp.inf)
        l_sc[...] = jnp.zeros_like(l_sc)
        acc_sc[...] = jnp.zeros_like(acc_sc)

    if is_mask:
        qi = pl.program_id(1)
        row = qi * tq + jax.lax.broadcasted_iota(jnp.int32, (tq, tk), 0)
        col = ki * tk + jax.lax.broadcasted_iota(jnp.int32, (tq, tk), 1)
        keep = col <= row                 # torch.triu(..., diagonal=1) masked

    for h in range(n_heads_q):            # static unroll over query heads
        q = q_ref[0, h]                    # (tq, Dh) bf16
        k = k_ref[0, h // n_rep]           # (tk, Dh) bf16  (shared KV head)
        v = v_ref[0, h // n_rep]
        # scores on the MXU, contracting last dims (no K^T materialized)
        s = jax.lax.dot_general(q, k, (((1,), (1,)), ((), ())),
                                preferred_element_type=jnp.float32) * scale
        if is_mask:
            s = jnp.where(keep, s, _MASK_VALUE)
        m_prev = m_sc[h]
        m_new = jnp.maximum(m_prev, jnp.max(s, axis=-1, keepdims=True))
        alpha = jnp.exp(m_prev - m_new)
        p = jnp.exp(s - m_new)
        l_sc[h] = alpha * l_sc[h] + jnp.sum(p, axis=-1, keepdims=True)
        acc_sc[h] = alpha * acc_sc[h] + jnp.dot(
            p.astype(v.dtype), v, preferred_element_type=jnp.float32)
        m_sc[h] = m_new

    @pl.when(ki == pl.num_programs(2) - 1)
    def _():
        for h in range(n_heads_q):         # lane-dense (B, S, d_model) output
            out = acc_sc[h] * pl.reciprocal(l_sc[h], approx=True)
            o_ref[0, :, h * dh:(h + 1) * dh] = out.astype(o_ref.dtype)


def attention(q, k, v, *, scale, is_mask, n_rep, tq=256, tk=256):
    """q: (B,Hq,S,Dh), k/v: (B,Hkv,S,Dh) bf16 -> (B, S, Hq*Dh) bf16."""
    B, Hq, S, D = q.shape
    Hkv = k.shape[1]
    d_model = Hq * D
    tq, tk = _tile(S, tq), _tile(S, tk)
    return pl.pallas_call(
        functools.partial(_attention_kernel, scale=scale, is_mask=is_mask,
                          n_rep=n_rep),
        out_shape=jax.ShapeDtypeStruct((B, S, d_model), jnp.bfloat16),
        grid=(B, S // tq, S // tk),
        in_specs=[pl.BlockSpec((1, Hq, tq, D), lambda b, qi, ki: (b, 0, qi, 0)),
                  pl.BlockSpec((1, Hkv, tk, D), lambda b, qi, ki: (b, 0, ki, 0)),
                  pl.BlockSpec((1, Hkv, tk, D), lambda b, qi, ki: (b, 0, ki, 0))],
        out_specs=pl.BlockSpec((1, tq, d_model), lambda b, qi, ki: (b, qi, 0)),
        scratch_shapes=[pltpu.VMEM((Hq, tq, 1), jnp.float32),
                        pltpu.VMEM((Hq, tq, 1), jnp.float32),
                        pltpu.VMEM((Hq, tq, D), jnp.float32)],
        compiler_params=pltpu.CompilerParams(
            dimension_semantics=("parallel", "parallel", "arbitrary")),
    )(q, k, v)


# ----------------------------------------------------------------------------
# MLP — post-attention RMSNorm fused in, hidden dim tiled & accumulated
# ----------------------------------------------------------------------------
def _mlp_kernel(x_ref, nw_ref, wg_ref, wu_ref, wd_ref, o_ref,
                xn_sc, acc_sc, *, eps):
    j = pl.program_id(1)

    @pl.when(j == 0)
    def _():
        x = x_ref[...].astype(jnp.float32)
        norm = jnp.sqrt(jnp.mean(x * x, axis=-1, keepdims=True)) + eps
        xn_sc[...] = ((x * (1.0 / norm)) * nw_ref[...]).astype(xn_sc.dtype)
        acc_sc[...] = jnp.zeros_like(acc_sc)

    xn = xn_sc[...]                                         # (tm, D) bf16
    g = jnp.dot(xn, wg_ref[...], preferred_element_type=jnp.float32)
    c = 0.7978845608028654                                  # sqrt(2/pi)
    g = 0.5 * g * (1.0 + jnp.tanh(c * (g + 0.044715 * g * g * g)))
    u = jnp.dot(xn, wu_ref[...], preferred_element_type=jnp.float32)
    acc_sc[...] += jnp.dot((g * u).astype(jnp.bfloat16), wd_ref[...],
                           preferred_element_type=jnp.float32)

    @pl.when(j == pl.num_programs(1) - 1)
    def _():
        o_ref[...] = acc_sc[...].astype(o_ref.dtype)


def gemma_mlp(x, norm_w, wg, wu, wd, *, eps, tm=256, th=512):
    """down(gelu_tanh(gate(xn)) * up(xn)), xn = rmsnorm(x)*norm_w. x: (M, D)."""
    M, D = x.shape
    H = wg.shape[1]
    tm, th = _tile(M, tm), _tile(H, th)
    return pl.pallas_call(
        functools.partial(_mlp_kernel, eps=eps),
        out_shape=jax.ShapeDtypeStruct((M, D), jnp.float32),
        grid=(M // tm, H // th),
        in_specs=[pl.BlockSpec((tm, D), lambda i, j: (i, 0)),
                  pl.BlockSpec((1, D), lambda i, j: (0, 0)),
                  pl.BlockSpec((D, th), lambda i, j: (0, j)),
                  pl.BlockSpec((D, th), lambda i, j: (0, j)),
                  pl.BlockSpec((th, D), lambda i, j: (j, 0))],
        out_specs=pl.BlockSpec((tm, D), lambda i, j: (i, 0)),
        scratch_shapes=[pltpu.VMEM((tm, D), jnp.bfloat16),
                        pltpu.VMEM((tm, D), jnp.float32)],
        compiler_params=pltpu.CompilerParams(
            dimension_semantics=("parallel", "arbitrary")),
    )(x, norm_w.reshape(1, D), wg, wu, wd)


# ----------------------------------------------------------------------------
# Model glue (plain JAX: embedding gather, rotary tables, reshapes, residuals)
# ----------------------------------------------------------------------------
def rotary_cos_sin(position_ids, head_dim, base):
    """GemmaRotaryEmbedding.forward -> cos, sin of shape (B, S, head_dim)."""
    inv_freq = 1.0 / (base ** (jnp.arange(0, head_dim, 2, dtype=jnp.float32)
                               / head_dim))
    freqs = position_ids.astype(jnp.float32)[:, :, None] * inv_freq[None, None]
    emb = jnp.concatenate([freqs, freqs], axis=-1)
    return jnp.cos(emb), jnp.sin(emb)


def attn_forward(p, x, position_ids, cfg, is_attn_mask):
    B, S, d_model = x.shape
    nq, nkv = cfg["num_heads_q"], cfg["num_heads_kv"]
    hd = d_model // nq
    x2d = x.reshape(B * S, d_model)

    # Single fused QKV projection (concatenated [wq|wk|wv] bf16 weight).
    qkv = linear(x2d, p["wqkv"], out_dtype=jnp.bfloat16)
    q_sz, kv_sz = nq * hd, nkv * hd
    # split_heads quirk reproduced: direct reshape to (B, H, S, Dh).
    Q = qkv[:, :q_sz].reshape(B, nq, S, hd)
    K = qkv[:, q_sz:q_sz + kv_sz].reshape(B, nkv, S, hd)
    V = qkv[:, q_sz + kv_sz:].reshape(B, nkv, S, hd)

    cos, sin = rotary_cos_sin(position_ids, hd, cfg["base"])
    Q, K = apply_rope_qk(Q, K, cos, sin)

    # KVCache starts empty -> cache contents == current K, V (prefill).
    # GQA handled inside the attention kernel (no repeat_kv materialization);
    # output comes back directly as (B, S, d_model) -> no transpose needed.
    scale = float(nq) ** (-0.5)   # reference scales by num_heads_q ** -0.5
    attn_out = attention(Q, K, V, scale=scale, is_mask=is_attn_mask,
                         n_rep=nq // nkv)
    return linear(attn_out.reshape(B * S, d_model),
                  p["wo"]).reshape(B, S, d_model)


def decoder_layer(p, x, position_ids, cfg, is_attn_mask):
    B, S, d_model = x.shape
    residual = x
    # NOTE: reference computes input_layernorm(x) but discards it; attention
    # consumes raw x. Dead compute skipped (no effect on the output).
    out = attn_forward(p, x, position_ids, cfg, is_attn_mask) + residual
    residual = out
    # post_attention RMSNorm is fused into the MLP kernel.
    mlp_out = gemma_mlp(out.reshape(B * S, d_model), p["post_norm"],
                        p["wg"], p["wu"], p["wd"], eps=cfg["eps_norm"])
    return mlp_out.reshape(B, S, d_model) + residual


def gemma_model(params, tokens_ids, position_ids, cfg, is_attn_mask=False):
    # TODO(synk): embedding gather stays in plain JAX (no tiled-gather kernel).
    emb = params["embed"][tokens_ids]                      # (B, S, d_model)
    out = emb
    # Reference bug reproduced: every layer gets `embedding` as its input,
    # only the last layer's output is kept.
    for lp in params["layers"]:
        out = decoder_layer(lp, emb, position_ids, cfg, is_attn_mask)
    B, S, d_model = out.shape
    out = rmsnorm(out.reshape(B * S, d_model), params["final_norm"],
                  cfg["eps_norm"]).reshape(B, S, d_model)
    return out


# ----------------------------------------------------------------------------
# Deterministic parameter init (weights stored in bf16 for the MXU)
# ----------------------------------------------------------------------------
def init_params(key, cfg):
    d = cfg["d_model"]
    hd = d // cfg["num_heads_q"]
    nq, nkv, hm = cfg["num_heads_q"], cfg["num_heads_kv"], cfg["hidden_mlp"]
    keys = jax.random.split(key, 1 + cfg["num_layers"])
    params = {
        "embed": jax.random.normal(keys[0], (cfg["vocab_size"], d),
                                   jnp.float32) * 0.02,
        "final_norm": jnp.ones((d,), jnp.float32),
        "layers": [],
    }
    for li in range(cfg["num_layers"]):
        lk = jax.random.split(keys[1 + li], 7)
        s = 0.05
        wq = jax.random.normal(lk[0], (d, nq * hd), jnp.float32) * s
        wk = jax.random.normal(lk[1], (d, nkv * hd), jnp.float32) * s
        wv = jax.random.normal(lk[2], (d, nkv * hd), jnp.float32) * s
        params["layers"].append({
            "wqkv": jnp.concatenate([wq, wk, wv], axis=1).astype(jnp.bfloat16),
            "wo": (jax.random.normal(lk[3], (d, d), jnp.float32) * s
                   ).astype(jnp.bfloat16),
            "wg": (jax.random.normal(lk[4], (d, hm), jnp.float32) * s
                   ).astype(jnp.bfloat16),
            "wu": (jax.random.normal(lk[5], (d, hm), jnp.float32) * s
                   ).astype(jnp.bfloat16),
            "wd": (jax.random.normal(lk[6], (hm, d), jnp.float32) * s
                   ).astype(jnp.bfloat16),
            "input_norm": jnp.ones((d,), jnp.float32),   # dead in reference
            "post_norm": jnp.ones((d,), jnp.float32),
        })
    return params


# ----------------------------------------------------------------------------
# Main
# ----------------------------------------------------------------------------
if __name__ == "__main__":
    cfg = dict(num_layers=2, vocab_size=64, d_model=32, num_heads_q=4,
               num_heads_kv=2, hidden_mlp=64, base=10000, eps_norm=1e-6)
    B, S = 2, 8

    key = jax.random.PRNGKey(0)
    k_params, k_tok = jax.random.split(key)
    params = init_params(k_params, cfg)

    tokens_ids = jax.random.randint(k_tok, (B, S), 0, cfg["vocab_size"],
                                    dtype=jnp.int32)
    position_ids = jnp.broadcast_to(jnp.arange(S, dtype=jnp.int32), (B, S))

    out = gemma_model(params, tokens_ids, position_ids, cfg,
                      is_attn_mask=False)
    out = jax.block_until_ready(out)
    assert out.shape == (B, S, cfg["d_model"]) and out.dtype == jnp.float32
    print("KERNEL_OK")
</pallas_src>

<mosaic_0001>
module attributes {stable_mosaic.version = 11 : i64} {
  func.func @_matmul_kernel(%arg0: i32, %arg1: i32, %arg2: i32, %arg3: memref<16x32xf32, #tpu.memory_space<vmem>>, %arg4: memref<32x64xbf16, #tpu.memory_space<vmem>>, %arg5: memref<16x64xbf16, #tpu.memory_space<vmem>>, %arg6: memref<16x64xf32, #tpu.memory_space<vmem>>) attributes {dimension_semantics = [#tpu.dimension_semantics<parallel>, #tpu.dimension_semantics<parallel>, #tpu.dimension_semantics<arbitrary>], iteration_bounds = array<i64: 1, 1, 1>, scalar_prefetch = 0 : i64, scratch_operands = 1 : i64, tpu.core_type = #tpu.core_type<tc>, window_params = [{transform_indices = @transform_0, window_bounds = array<i64: 16, 32>}, {transform_indices = @transform_1, window_bounds = array<i64: 32, 64>}, {transform_indices = @transform_2, window_bounds = array<i64: 16, 64>}]} {
    %c0_i32 = arith.constant 0 : i32
    %0 = arith.cmpi eq, %arg2, %c0_i32 : i32
    %1 = arith.extui %0 : i1 to i32
    %c0_i32_0 = arith.constant 0 : i32
    %2 = arith.cmpi ne, %1, %c0_i32_0 : i32
    scf.if %2 {
      %cst_10 = arith.constant 0.000000e+00 : f32
      %13 = vector.broadcast %cst_10 : f32 to vector<16x64xf32>
      %c0_11 = arith.constant 0 : index
      %c0_12 = arith.constant 0 : index
      %14 = vector.load %arg6[%c0_11, %c0_12] : memref<16x64xf32, #tpu.memory_space<vmem>>, vector<16x64xf32>
      tpu.vector_store %arg6[%c0_11, %c0_12], %13 {strides = array<i32>} : memref<16x64xf32, #tpu.memory_space<vmem>>, vector<16x64xf32>,
    } else {
    }
    %c0 = arith.constant 0 : index
    %c0_1 = arith.constant 0 : index
    %3 = vector.load %arg6[%c0, %c0_1] : memref<16x64xf32, #tpu.memory_space<vmem>>, vector<16x64xf32>
    %c0_2 = arith.constant 0 : index
    %c0_3 = arith.constant 0 : index
    %4 = vector.load %arg3[%c0_2, %c0_3] : memref<16x32xf32, #tpu.memory_space<vmem>>, vector<16x32xf32>
    %5 = arith.truncf %4 : vector<16x32xf32> to vector<16x32xbf16>
    %c0_4 = arith.constant 0 : index
    %c0_5 = arith.constant 0 : index
    %6 = vector.load %arg4[%c0_4, %c0_5] : memref<32x64xbf16, #tpu.memory_space<vmem>>, vector<32x64xbf16>
    %cst = arith.constant dense<0.000000e+00> : vector<16x64xf32>
    %7 = tpu.matmul %5, %6, %cst {dimension_numbers = #tpu.dot_dimension_numbers<[1], [0], [0], [1], [0, 0, 1, 1], [], []>} : vector<16x32xbf16>, vector<32x64xbf16>, vector<16x64xf32> -> vector<16x64xf32>
    %8 = arith.addf %3, %7 : vector<16x64xf32>
    %c0_6 = arith.constant 0 : index
    %c0_7 = arith.constant 0 : index
    %9 = vector.load %arg6[%c0_6, %c0_7] : memref<16x64xf32, #tpu.memory_space<vmem>>, vector<16x64xf32>
    tpu.vector_store %arg6[%c0_6, %c0_7], %8 {strides = array<i32>} : memref<16x64xf32, #tpu.memory_space<vmem>>, vector<16x64xf32>,
    %c0_i32_8 = arith.constant 0 : i32
    %10 = arith.cmpi eq, %arg2, %c0_i32_8 : i32
    %11 = arith.extui %10 : i1 to i32
    %c0_i32_9 = arith.constant 0 : i32
    %12 = arith.cmpi ne, %11, %c0_i32_9 : i32
    scf.if %12 {
      %c0_10 = arith.constant 0 : index
      %c0_11 = arith.constant 0 : index
      %13 = vector.load %arg6[%c0_10, %c0_11] : memref<16x64xf32, #tpu.memory_space<vmem>>, vector<16x64xf32>
      %14 = arith.truncf %13 : vector<16x64xf32> to vector<16x64xbf16>
      %c0_12 = arith.constant 0 : index
      %c0_13 = arith.constant 0 : index
      %15 = vector.load %arg5[%c0_12, %c0_13] : memref<16x64xbf16, #tpu.memory_space<vmem>>, vector<16x64xbf16>
      tpu.vector_store %arg5[%c0_12, %c0_13], %14 {strides = array<i32>} : memref<16x64xbf16, #tpu.memory_space<vmem>>, vector<16x64xbf16>,
    } else {
    }
    return
  }
  func.func @transform_0(%arg0: i32, %arg1: i32, %arg2: i32) -> (i32, i32) {
    %c0_i32 = arith.constant 0 : i32
    return %arg0, %arg2 : i32, i32
  }
  func.func @transform_1(%arg0: i32, %arg1: i32, %arg2: i32) -> (i32, i32) {
    %c0_i32 = arith.constant 0 : i32
    return %arg2, %arg1 : i32, i32
  }
  func.func @transform_2(%arg0: i32, %arg1: i32, %arg2: i32) -> (i32, i32) {
    %c0_i32 = arith.constant 0 : i32
    return %arg0, %arg1 : i32, i32
  }
}

</mosaic_0001>

<bundles_post_ra>
// kernel: tpu_custom_call.1
= control target key start
LH: loop header
LB: loop body
LE: loop exit
PB: predicated region body
PF: predicated region fallthrough
CT: control target
= control target key end

     0   :  { %7 = vsyncpa [#allocation4], 0  ;;  %s291_s0 = inlined_call_operand.hbm [shape: f32[16,32], index: 0, kind: input, shape index: {}]   ;;  %s292_s1 = inlined_call_operand.hbm [shape: bf16[32,64], index: 1, kind: input, shape index: {}]   ;;  %s293_s2 = inlined_call_operand.hbm [shape: bf16[16,64], index: 2, kind: output, shape index: {}]  }
   0x1   :  { %8 = vsyncpa [#allocation7], 0 }
   0x2   :  { %9 = vsyncpa [#allocation5], 0  ;;  %s248_s9 = smov [#allocation3]  }
   0x3   :  { %s15_s10 = sshll.u32 %s248_s9, 4  ;;  %s16_s10 = int_to_ptr.vmem [resolvable:$true] %s15_s10 }
   0x4   :  { %s190_s11 = scalar_lea.vmem %s16_s10, 256  ;;  %p195_p1 = scmp.lt.s32.totalorder %s16_s10, %s16_s10 }
   0x5   :  { %p191_p0 = scmp.ne.s32.totalorder %s16_s10, %s190_s11  ;;  %p196_p2 = scmp.lt.s32.totalorder %s190_s11, %s190_s11 }
   0x7   :  { %p197_p3 = por %p196_p2, %p195_p1 }
   0x9   :  { %p198_p4 = pnand %p197_p3, %p191_p0 }
   0xb   :  { %201 = shalt.err (!%p198_p4)
}
   0xc   :  { %s249_s12 = smov 128   ;;  %s250_s13 = smov 8  }
   0xd   :  { %21 = dma.hbm_to_vmem [thread:$0]  %s291_s0, 256, %s16_s10, [#allocation4], %s249_s12, %s249_s12, %s250_s13  }
   0xe   :  { %s251_s16 = smov [#allocation6]  }
   0xf   :  { %s27_s17 = sshll.u32 %s251_s16, 4  ;;  %s28_s17 = int_to_ptr.vmem [resolvable:$true] %s27_s17 }
  0x10   :  { %s210_s18 = scalar_lea.vmem %s28_s17, 256  ;;  %p215_p6 = scmp.lt.s32.totalorder %s28_s17, %s28_s17 }
  0x11   :  { %p211_p5 = scmp.ne.s32.totalorder %s28_s17, %s210_s18  ;;  %p216_p7 = scmp.lt.s32.totalorder %s210_s18, %s210_s18 }
  0x13   :  { %p217_p8 = por %p216_p7, %p215_p6 }
  0x15   :  { %p218_p9 = pnand %p217_p8, %p211_p5 }
  0x17   :  { %221 = shalt.err (!%p218_p9)
}
  0x18   :  { %s252_s19 = smov 64   ;;  %s253_s20 = smov 4  }
  0x19   :  { %33 = dma.hbm_to_vmem [thread:$0]  %s292_s1, 256, %s28_s17, [#allocation7], %s252_s19, %s252_s19, %s253_s20  }
  0x1a   :  { %242 = dma.done.wait [#allocation4], 256  }
  0x1b   :  { %243 = vsyncadd [#allocation4], 4294967040 }
  0x1c   :  { %244 = dma.done.wait [#allocation7], 256  }
  0x1d   :  { %245 = vsyncadd [#allocation7], 4294967040  ;;  %vm45_vm0 = vcmask 523264   ;;  %v254_v0 = vmov 0.0   ;;  %vm255_vm1 = vmmov 0   ;;  %v180_v1 = vld [vmem:[#allocation6 + $0x8] sm:$0xff]  }
  0x1e   :  { %46 = vst.msk [vmem:[#allocation2] sm:$0xff] %vm45_vm0, %v254_v0  ;;  %47 = vst.msk [vmem:[#allocation2 + $0x8] sm:$0xff] %vm45_vm0, %v254_v0  ;;  %163 = vmatprep.subr.bf16.mxu0 %v254_v0  ;;  %167 = vmatprep.mubr.msk.bf16.mxu0 %vm255_vm1, %v254_v0  ;;  %v181_v2 = vld [vmem:[#allocation6] sm:$0xff]   ;;  %v50_v3 = vld [vmem:[#allocation3] sm:$0xff]  ;;  %vm69_vm2 = vcmask 261120   ;;  %vm132_vm3 = vcmask 519168  }
  0x1f   :  { %164 = vmatpush3.bf16.msra.mxu0 %v180_v1  ;;  %v51_v4 = vld [vmem:[#allocation3 + $0x8] sm:$0xff]  ;;  %s256_s0 = smov [#allocation8]  }
  0x20   :  { %165 = vmatprep.subr.bf16.mxu0 %v254_v0  ;;  %v52_v5 = vpack.c.bf16 %v51_v4, %v50_v3  ;;  %s140_s1 = sshll.u32 %s256_s0, 4  ;;  %s141_s1 = int_to_ptr.vmem [resolvable:$true] %s140_s1 }
  0x21   :  { %s222_s23 = scalar_lea.vmem %s141_s1, 128  ;;  %p227_p11 = scmp.lt.s32.totalorder %s141_s1, %s141_s1 }
  0x22   :  { %p223_p10 = scmp.ne.s32.totalorder %s141_s1, %s222_s23  ;;  %p228_p12 = scmp.lt.s32.totalorder %s222_s23, %s222_s23 }
  0x23   :  { %166 = vmatpush3.bf16.msra.mxu0 %v181_v2 }
  0x24   :  { %p229_p13 = por %p228_p12, %p227_p11 }
  0x25   :  { %v48_v6 = vld [vmem:[#allocation2] sm:$0xff]  ;;  %v49_v10 = vld [vmem:[#allocation2 + $0x8] sm:$0xff] }
  0x26   :  { %168 = vmatmul.mubr.msk.bf16.vlgmr.msra.gmra.mxu0 %vm69_vm2, %v52_v5  ;;  %p230_p0 = pnand %p229_p13, %p223_p10 }
  0xe6   :  { %v107_v7 = vpop.f32.mrf.mxu0 }
  0xe7   :  { %v114_v8 = vadd.f32 %v107_v7, %v48_v6 }
  0xe8   :  { %v169_v9 = vpop.f32.mrf.mxu0 }
  0xe9   :  { %117 = vst.msk [vmem:[#allocation2] sm:$0xff] %vm45_vm0, %v114_v8 }
  0xea   :  { %v110_v11 = vpop.f32.mrf.mxu0 }
  0xeb   :  { %v115_v12 = vadd.f32 %v110_v11, %v49_v10 }
  0xec   :  { %v170_v13 = vpop.f32.mrf.mxu0 }
  0xed   :  { %118 = vst.msk [vmem:[#allocation2 + $0x8] sm:$0xff] %vm45_vm0, %v115_v12 }
  0xf0   :  { %v122_v14 = vld [vmem:[#allocation2] sm:$0xff] }
  0xf1   :  { %v158_v15 = vpack.c.bf16 %v122_v14, %v122_v14 }
  0xf3   :  { %133 = vst.msk [vmem:[#allocation8] sm:$0xf] %vm132_vm3, %v158_v15 }
  0xf4   :  { %v123_v16 = vld [vmem:[#allocation2 + $0x8] sm:$0xff] }
  0xf5   :  { %v159_v17 = vpack.c.bf16 %v123_v16, %v123_v16 }
  0xf7   :  { %134 = vst.msk [vmem:[#allocation8 + $0x4] sm:$0xf] %vm132_vm3, %v159_v17 }
  0xf8   :  { %233 = shalt.err (!%p230_p0)
}
  0xf9   :  { %146 = dma.vmem_to_hbm [thread:$0]  %s141_s1, 128, %s293_s2, [#allocation5], %s252_s19, %s252_s19, %s253_s20  }
  0xfa   :  { %246 = dma.done.wait [#allocation5], 128  }
  0xfb   :  { %247 = vsyncadd [#allocation5], 4294967168 }
  0xfc   :  { %150 = vsyncpa [#allocation4], 1 }
  0xfd   :  { %151 = vsyncpa [#allocation7], 1 }
  0xfe   :  { %152 = vsyncpa [#allocation5], 1 }

</bundles_post_ra>
